<compile_context>
chip_gen: v6e
topology: v6e:2x2x1
jax: 0.10.0
libtpu: 0.0.40
codegen_flags: <defaults>
</compile_context>

<pallas_src>
import jax
import jax.numpy as jnp
from jax import lax
from jax.experimental import pallas as pl
from jax.experimental.pallas import tpu as pltpu


def _cdiv(a: int, b: int) -> int:
    return -(-a // b)


def _outconv_kernel(x_ref, w_ref, b_ref, o_ref):
    """1x1 conv + bias on one (batch-block, lane-tile) block.

    x_ref : (NB, Cin, TL)   input tile (spatial pixels along lanes), VMEM
    w_ref : (Cout, Cin)     1x1 conv weight, VMEM (resident, tiny)
    b_ref : (Cout, 1)       bias, VMEM
    o_ref : (NB, Cout, TL)  output tile
    """
    w = w_ref[...]
    b = b_ref[...]
    for i in range(x_ref.shape[0]):                       # NB is small & static
        y = jnp.dot(w, x_ref[i],
                    precision=lax.Precision.HIGHEST,
                    preferred_element_type=jnp.float32)   # (Cout, TL) on MXU
        o_ref[i] = (y + b).astype(o_ref.dtype)


def _plan_tiling(N: int, Cin: int, Cout: int, HW: int,
                 budget_bytes: int = 24 << 20):
    """Pick (NB, TL): batch rows and lane pixels per grid step.

    Double-buffered in+out VMEM per step is 2 * NB * (Cin+Cout) * TL * 4 bytes;
    keep it under `budget_bytes` (safe on v7x's 64 MiB VMEM and well inside the
    raised scoped limit on v5e/v6e).
    """
    # Cap on NB * TL elements given the budget.
    rows_x_lanes = max(128, budget_bytes // (8 * (Cin + Cout)))

    if HW < 128:
        TL = HW                                # full extent -> legal block dim
    else:
        TL = (HW // 128) * 128                 # lane-dense multiple of 128
        TL = min(TL, max(128, (rows_x_lanes // 128) * 128))

    NB = max(1, min(N, rows_x_lanes // max(TL, 1)))

    # Keep >= 2 grid steps so both v7x TensorCores get work (harmless on
    # single-TC v5e / v6e).
    if _cdiv(N, NB) * _cdiv(HW, TL) < 2:
        if N >= 2:
            NB = _cdiv(N, 2)
        elif HW >= 256 and TL >= 256:
            TL = max(128, ((TL // 2) // 128) * 128)
    return NB, TL


def out_conv_pallas(x_nchw, weight_2d, bias):
    """x_nchw: (N, Cin, H, W); weight_2d: (Cout, Cin); bias: (Cout,)."""
    N, Cin, H, W = x_nchw.shape
    Cout = weight_2d.shape[0]
    HW = H * W

    NB, TL = _plan_tiling(N, Cin, Cout, HW)

    x = x_nchw.reshape(N, Cin, HW)           # pure reshape: no transpose/copy
    b = bias.reshape(Cout, 1)

    grid = (_cdiv(N, NB), _cdiv(HW, TL))     # cdiv: tail tiles are masked

    cost = pl.CostEstimate(
        flops=2 * N * Cout * Cin * HW,
        transcendentals=0,
        bytes_accessed=4 * (N * (Cin + Cout) * HW + Cout * Cin + Cout),
    )

    out = pl.pallas_call(
        _outconv_kernel,
        out_shape=jax.ShapeDtypeStruct((N, Cout, HW), jnp.float32),
        grid_spec=pltpu.PrefetchScalarGridSpec(
            num_scalar_prefetch=0,
            grid=grid,
            in_specs=[
                pl.BlockSpec((NB, Cin, TL), lambda n, l: (n, 0, l)),
                pl.BlockSpec((Cout, Cin), lambda n, l: (0, 0)),
                pl.BlockSpec((Cout, 1), lambda n, l: (0, 0)),
            ],
            out_specs=pl.BlockSpec((NB, Cout, TL), lambda n, l: (n, 0, l)),
        ),
        compiler_params=pltpu.CompilerParams(
            dimension_semantics=("parallel", "parallel"),
            vmem_limit_bytes=48 * 1024 * 1024,
        ),
        cost_estimate=cost,
    )(x, weight_2d, b)
    return out.reshape(N, Cout, H, W)


@jax.jit
def out_conv(x_nchw, weight_oihw, bias):
    """Forward of PyTorch OutConv: Conv2d(in, out, kernel_size=1) with bias."""
    Cout, Cin = weight_oihw.shape[0], weight_oihw.shape[1]
    w2d = weight_oihw.reshape(Cout, Cin)      # (Cout, Cin, 1, 1) -> (Cout, Cin)
    return out_conv_pallas(x_nchw.astype(jnp.float32), w2d.astype(jnp.float32),
                           bias.astype(jnp.float32))


# ----------------------- pure-JAX reference (for checking) -------------------
def out_conv_ref(x_nchw, weight_oihw, bias):
    y = lax.conv_general_dilated(
        x_nchw, weight_oihw, window_strides=(1, 1), padding="VALID",
        dimension_numbers=("NCHW", "OIHW", "NCHW"))
    return y + bias.reshape(1, -1, 1, 1)


# ------------------------------------ main ------------------------------------
if __name__ == "__main__":
    in_channels, out_channels = 4, 8
    N, H, W = 2, 16, 16

    key = jax.random.PRNGKey(0)
    kx, kw, kb = jax.random.split(key, 3)

    x = jax.random.normal(kx, (N, in_channels, H, W), dtype=jnp.float32)
    # PyTorch Conv2d weight layout: (Cout, Cin, 1, 1), plus bias (Cout,).
    weight = jax.random.normal(kw, (out_channels, in_channels, 1, 1),
                               jnp.float32) * 0.1
    bias = 0.1 * jax.random.normal(kb, (out_channels,), jnp.float32)

    out = jax.block_until_ready(out_conv(x, weight, bias))
    ref = jax.block_until_ready(out_conv_ref(x, weight, bias))

    assert out.shape == (N, out_channels, H, W), out.shape
    assert jnp.allclose(out, ref, atol=1e-4, rtol=1e-4), float(
        jnp.max(jnp.abs(out - ref)))

    print("KERNEL_OK")
</pallas_src>

<mosaic_0001>
module attributes {stable_mosaic.version = 11 : i64} {
  func.func @_outconv_kernel(%arg0: i32, %arg1: i32, %arg2: memref<1x4x256xf32, #tpu.memory_space<vmem>>, %arg3: memref<8x4xf32, #tpu.memory_space<vmem>>, %arg4: memref<8x1xf32, #tpu.memory_space<vmem>>, %arg5: memref<1x8x256xf32, #tpu.memory_space<vmem>>) attributes {dimension_semantics = [#tpu.dimension_semantics<parallel>, #tpu.dimension_semantics<parallel>], iteration_bounds = array<i64: 2, 1>, scalar_prefetch = 0 : i64, scratch_operands = 0 : i64, tpu.core_type = #tpu.core_type<tc>, window_params = [{transform_indices = @transform_0, window_bounds = array<i64: 1, 4, 256>}, {pipeline_mode = #tpu.pipeline_mode<synchronous>, transform_indices = @transform_1, window_bounds = array<i64: 8, 4>}, {pipeline_mode = #tpu.pipeline_mode<synchronous>, transform_indices = @transform_2, window_bounds = array<i64: 8, 1>}, {transform_indices = @transform_3, window_bounds = array<i64: 1, 8, 256>}]} {
    %c0 = arith.constant 0 : index
    %c0_0 = arith.constant 0 : index
    %0 = vector.load %arg3[%c0, %c0_0] : memref<8x4xf32, #tpu.memory_space<vmem>>, vector<8x4xf32>
    %c0_1 = arith.constant 0 : index
    %c0_2 = arith.constant 0 : index
    %1 = vector.load %arg4[%c0_1, %c0_2] : memref<8x1xf32, #tpu.memory_space<vmem>>, vector<8x1xf32>
    %c0_3 = arith.constant 0 : index
    %c0_4 = arith.constant 0 : index
    %c0_5 = arith.constant 0 : index
    %2 = vector.load %arg2[%c0_3, %c0_4, %c0_5] : memref<1x4x256xf32, #tpu.memory_space<vmem>>, vector<1x4x256xf32>
    %3 = vector.shape_cast %2 : vector<1x4x256xf32> to vector<4x256xf32>
    %cst = arith.constant dense<0.000000e+00> : vector<8x256xf32>
    %4 = tpu.matmul %0, %3, %cst {dimension_numbers = #tpu.dot_dimension_numbers<[1], [0], [0], [1], [0, 0, 1, 1], [], []>, precision = #tpu.contract_precision<fp32>} : vector<8x4xf32>, vector<4x256xf32>, vector<8x256xf32> -> vector<8x256xf32>
    %5 = vector.broadcast %1 : vector<8x1xf32> to vector<8x256xf32>
    %6 = arith.addf %4, %5 : vector<8x256xf32>
    %c0_6 = arith.constant 0 : index
    %c0_7 = arith.constant 0 : index
    %c0_8 = arith.constant 0 : index
    %7 = vector.load %arg5[%c0_6, %c0_7, %c0_8] : memref<1x8x256xf32, #tpu.memory_space<vmem>>, vector<1x8x256xf32>
    %8 = vector.shape_cast %7 : vector<1x8x256xf32> to vector<8x256xf32>
    %9 = vector.shape_cast %6 : vector<8x256xf32> to vector<1x8x256xf32>
    tpu.vector_store %arg5[%c0_6, %c0_7, %c0_8], %9 {strides = array<i32>} : memref<1x8x256xf32, #tpu.memory_space<vmem>>, vector<1x8x256xf32>,
    return
  }
  func.func @transform_0(%arg0: i32, %arg1: i32) -> (i32, i32, i32) {
    %c0_i32 = arith.constant 0 : i32
    %c0_i32_0 = arith.constant 0 : i32
    return %arg0, %c0_i32, %arg1 : i32, i32, i32
  }
  func.func @transform_1(%arg0: i32, %arg1: i32) -> (i32, i32) {
    %c0_i32 = arith.constant 0 : i32
    %c0_i32_0 = arith.constant 0 : i32
    %c0_i32_1 = arith.constant 0 : i32
    return %c0_i32, %c0_i32_0 : i32, i32
  }
  func.func @transform_2(%arg0: i32, %arg1: i32) -> (i32, i32) {
    %c0_i32 = arith.constant 0 : i32
    %c0_i32_0 = arith.constant 0 : i32
    %c0_i32_1 = arith.constant 0 : i32
    return %c0_i32, %c0_i32_0 : i32, i32
  }
  func.func @transform_3(%arg0: i32, %arg1: i32) -> (i32, i32, i32) {
    %c0_i32 = arith.constant 0 : i32
    %c0_i32_0 = arith.constant 0 : i32
    return %arg0, %c0_i32, %arg1 : i32, i32, i32
  }
}

</mosaic_0001>

<bundles_post_ra>
// kernel: out_conv.1
= control target key start
LH: loop header
LB: loop body
LE: loop exit
PB: predicated region body
PF: predicated region fallthrough
CT: control target
= control target key end

     0   :  { %s870_s12 = smov 0   ;;  %s872_s13 = smov 0   ;;  %s913_s0 = inlined_call_operand.vmem [shape: f32[2,4,256], index: 0, kind: input, shape index: {}]   ;;  %s914_s1 = inlined_call_operand.vmem [shape: f32[8,4], index: 1, kind: input, shape index: {}]   ;;  %s915_s2 = inlined_call_operand.vmem [shape: f32[8,1], index: 2, kind: input, shape index: {}]   ;;  %s916_s3 = inlined_call_operand.vmem [shape: f32[2,8,256], index: 3, kind: output, shape index: {}]  }
   0x1   :  { %s874_s14 = smov 0  }
   0x2 LB: > { %s25_s15 = sadd.s32 1, %s842_s13  ;;  %p787_p0 = scmp.ge.s32.totalorder %s846_s14, 1  ;;  %s846_s14 = sphi %s874_s14, %s13_s14   ;;  %s842_s13 = sphi %s872_s13, %s918_s13   ;;  %s838_s12 = sphi %s870_s12, %s917_s12  }
   0x3   : > { %p27_p1 = scmp.ge.s32.totalorder %s25_s15, 2  ;;  %p158_p2 = scmp.lt.s32.totalorder %s846_s14, 3 }
   0x5   : > { %s920_s15 = smov (%p27_p1, %s25_s15), 0  ;;  %p159_p3 = pnand %p787_p0, %p158_p2 }
   0x6   : > { %p191_p4 = scmp.lt.s32.totalorder (!%p159_p3), %s838_s12, 1 }
   0x7   : > { %162 = sbr.rel (%p159_p3) target bundleno = 238 (0xee), region = 32 }
   0xc   : > { %v210_v0 = vld [vmem:[%s914_s1] sm:$0xff]  ;;  %vm220_vm0 = vcmask 31744   ;;  %v848_v1 = vmov 0.0   ;;  %s922_s12 = smov (!%p191_p4, %s838_s12), 1  ;;  %v849_v5 = vmov 0   ;;  %vm224_vm1 = vcmask 1043456  }
   0xd   : > { %295 = vmatprep.mubr.f32.mxu0 %v848_v1  ;;  %v222_v2 = vsel %vm220_vm0, %v210_v0, 0  ;;  %381 = vmatprep.mubr.f32.mxu1 %v848_v1  ;;  %v211_v3 = vld [vmem:[%s915_s2] sm:$0xff]  ;;  %s794_s20 = sshll.u32 %s922_s12, 3  ;;  %s795_s24 = sshll.u32 %s922_s12, 4 }
   0xe   : > { %v296_v4 = vand.u32 4294901760, %v222_v2  ;;  %822 = vset.pattern.permute.xlu0 %v849_v5  ;;  %s198_s23 = scalar_lea.vmem %s913_s0, %s794_s20  ;;  %s208_s27 = scalar_lea.vmem %s916_s3, %s795_s24 }
   0xf   : > { %215 = vperm.xlu0 %822, %v211_v3   ;;  %v212_v7 = vld [vmem:[%s198_s23] sm:$0xff] }
  0x10   : > { %v297_v6 = vsub.f32 %v222_v2, %v296_v4  ;;  %v219_v9 = vcombine.high %v212_v7, %v212_v7  ;;  %v225_v10 = vsel %vm224_vm1, %v212_v7, 0 }
  0x11   : > { %v261_v11 = vand.u32 4294901760, %v225_v10 }
  0x12   : > { %v298_v8 = vand.u32 4294901760, %v297_v6  ;;  %v227_v13 = vsel %vm224_vm1, %v219_v9, 0 }
  0x13   : > { %v259_v14 = vand.u32 4294901760, %v227_v13  ;;  %v344_v16 = vsub.f32 %v225_v10, %v261_v11 }
  0x14   : > { %v299_v12 = vsub.f32 %v297_v6, %v298_v8 }
  0x15   : > { %260 = vmatprep.subr.mxu0 %v259_v14  ;;  %v338_v17 = vsub.f32 %v227_v13, %v259_v14  ;;  %v345_v18 = vand.u32 4294901760, %v344_v16 }
  0x16   : > { %v300_v15 = vand.u32 4294901760, %v299_v12  ;;  %262 = vmatpush1.msra.mxu0 %v261_v11 }
  0x17   : > { %v339_v19 = vand.u32 4294901760, %v338_v17  ;;  %421 = vmatprep.subr.mxu0 %v338_v17  ;;  %v346_v20 = vsub.f32 %v344_v16, %v345_v18 }
  0x18   : > { %301 = vmatmul.mubr.f32.vlgmr.msra.gmra.mxu0 %v300_v15 }
  0x19   : > { %424 = vmatpush1.msra.mxu0 %v344_v16  ;;  %457 = vmatprep.mubr.f32.mxu0 %v848_v1  ;;  %v340_v21 = vsub.f32 %v338_v17, %v339_v19  ;;  %v347_v22 = vand.u32 4294901760, %v346_v20 }
  0x1a   : > { %575 = vmatprep.subr.mxu0 %v339_v19 }
  0x1b   : > { %v341_v23 = vand.u32 4294901760, %v340_v21 }
  0x1c   : > { %460 = vmatmul.mubr.f32.vlgmr.msra.gmra.mxu0 %v297_v6 }
  0x1d   : > { %579 = vmatpush1.msra.mxu0 %v345_v18  ;;  %612 = vmatprep.mubr.f32.mxu0 %v848_v1 }
  0x1e   : > { %342 = vmatprep.subr.mxu1 %v341_v23 }
  0x1f   : > { %348 = vmatpush1.msra.mxu1 %v347_v22 }
  0x20   : > { %383 = vmatmul.mubr.f32.vlgmr.msra.gmra.mxu1 %v296_v4  ;;  %497 = vmatprep.subr.mxu1 %v259_v14 }
  0x21   : > { %499 = vmatpush1.msra.mxu1 %v261_v11  ;;  %532 = vmatprep.mubr.f32.mxu1 %v848_v1 }
  0x22   : > { %651 = vmatprep.subr.mxu1 %v259_v14  ;;  %614 = vmatmul.mubr.f32.vlgmr.msra.gmra.mxu0 %v296_v4 }
  0x24   : > { %536 = vmatmul.mubr.f32.vlgmr.msra.gmra.mxu1 %v298_v8 }
  0x25   : > { %653 = vmatpush1.msra.mxu1 %v261_v11  ;;  %686 = vmatprep.mubr.f32.mxu1 %v848_v1 }
  0x28   : > { %688 = vmatmul.mubr.f32.vlgmr.msra.gmra.mxu1 %v296_v4 }
  0x8a   : > { %v216_v25 = vpop.permute.xlu0 %215 }
  0xd8   : > { %v302_v24 = vpop.f32.mrf.mxu0 }
  0xd9   : > { %v303_v28 = vadd.f32 %v302_v24, %v216_v25 }
  0xda   : > { %v304_v26 = vpop.f32.mrf.mxu0 }
  0xdb   : > { %v305_v31 = vadd.f32 %v304_v26, %v216_v25 }
  0xdc   : > { %v461_v27 = vpop.f32.mrf.mxu0 }
  0xde   : > { %v463_v30 = vpop.f32.mrf.mxu0 }
  0xe0   : > { %v384_v29 = vpop.f32.mrf.mxu1 }
  0xe1   : > { %v385_v32 = vadd.f32 %v384_v29, %v303_v28 }
  0xe2   : > { %v386_v33 = vpop.f32.mrf.mxu1  ;;  %v615_v37 = vpop.f32.mrf.mxu0 }
  0xe3   : > { %v462_v34 = vadd.f32 %v461_v27, %v385_v32  ;;  %v387_v35 = vadd.f32 %v386_v33, %v305_v31 }
  0xe4   : > { %v537_v36 = vpop.f32.mrf.mxu1  ;;  %v617_v43 = vpop.f32.mrf.mxu0 }
  0xe5   : > { %v464_v38 = vadd.f32 %v463_v30, %v387_v35  ;;  %v538_v39 = vadd.f32 %v537_v36, %v462_v34 }
  0xe6   : > { %v539_v40 = vpop.f32.mrf.mxu1 }
  0xe7   : > { %v616_v41 = vadd.f32 %v615_v37, %v538_v39  ;;  %v540_v42 = vadd.f32 %v539_v40, %v464_v38 }
  0xe8   : > { %v689_v44 = vpop.f32.mrf.mxu1 }
  0xe9   : > { %v618_v45 = vadd.f32 %v617_v43, %v540_v42  ;;  %v690_v46 = vadd.f32 %v689_v44, %v616_v41 }
  0xea   : > { %v691_v47 = vpop.f32.mrf.mxu1 }
  0xeb   : > { %694 = vst [vmem:[%s208_s27] sm:$0xff] %v690_v46  ;;  %v692_v48 = vadd.f32 %v691_v47, %v618_v45 }
  0xed   : > { %695 = vst [vmem:[%s208_s27 + $0x8] sm:$0xff] %v692_v48 }
  0xee PF: > { %s13_s14 = sadd.s32 1, %s846_s14   ;;  %s917_s12 = smov %s842_s13 }
  0xef   : > { %p10_p5 = scmp.ge.s32.totalorder %s13_s14, 4   ;;  %s918_s13 = smov %s920_s15 }
  0xf1   :  { %12 = sbr.rel (!%p10_p5) target bundleno = 2 (0x2), region = 62 }

</bundles_post_ra>
